<compile_context>
chip_gen: v5e
topology: v5e:2x2
jax: 0.10.0
libtpu: 0.0.40
codegen_flags: <defaults>
</compile_context>

<pallas_src>
import functools

import jax
import jax.numpy as jnp
from jax.experimental import pallas as pl
from jax.experimental.pallas import tpu as pltpu


def _avg_k_from_last_kernel(mask_ref, x_ref, inv_den_ref, out_ref, *, precision):
    # mask_ref:    (Bt, 1, tS)  pad-mask tile (0/1), x.dtype, lane-dense in S
    # x_ref:       (Bt, tS, tH) encoder-layer tile, native dtype
    # inv_den_ref: (Bt, 1)      f32: 1 / (mask row-sum + tol)
    # out_ref:     (Bt, tH)     f32 resident accumulator / final pooled output
    s = pl.program_id(2)

    @pl.when(s == 0)
    def _init():
        out_ref[...] = jnp.zeros_like(out_ref)

    # Masked partial sum over this sequence tile on the MXU, f32 accumulation.
    part = jax.lax.dot_general(
        mask_ref[...], x_ref[...],
        dimension_numbers=(((2,), (1,)), ((0,), (0,))),
        preferred_element_type=jnp.float32,
        precision=precision,
    )                                              # (Bt, 1, tH)
    out_ref[...] += part.reshape(out_ref.shape)    # pack batch onto sublanes

    @pl.when(s == pl.num_programs(2) - 1)
    def _finalize():
        out_ref[...] = out_ref[...] * inv_den_ref[...]


def _divisor_tiles(full, unit):
    """Legal block sizes for a dim: the full extent, or multiples of `unit`
    that divide it (satisfies the (8,128) block rule)."""
    opts = {full} | {t for t in range(unit, full, unit) if full % t == 0}
    return sorted(opts, reverse=True)


def _choose_tiles(B, S, H, x_itemsize, mask_itemsize, budget_bytes,
                  x_block_cap_bytes=16 * 1024 * 1024):
    """Pick (Bt, tS, tH) for blocks mask:(Bt,1,tS) x:(Bt,tS,tH) out:(Bt,tH)."""
    bt_opts = _divisor_tiles(B, 8)      # out/inv_den sublane dim: %8 or == B
    ts_opts = _divisor_tiles(S, 128)    # mask lane dim: %128 or == S
    ht_opts = _divisor_tiles(H, 128)    # x/out lane dim: %128 or == H

    def footprint(bt, ts, ht):
        # Double-buffered pipeline footprint (default Buffered(2) everywhere).
        x_blk = bt * ts * ht * x_itemsize
        m_blk = bt * ts * mask_itemsize
        o_blk = bt * ht * 4
        d_blk = bt * 4
        return 2 * (x_blk + m_blk + o_blk + d_blk)

    # Prefer >= 2 batch programs so v7x's second TensorCore gets work
    # (one extra ~0.35us grid step on 1-TC chips: negligible).
    bt_pref = [b for b in bt_opts if B // b >= 2] or list(bt_opts)

    for ht in ht_opts:                      # prefer un-split H
        for ts in ts_opts:                  # grow tS before bt
            for bt in bt_pref:              # then the largest fitting bt
                if (footprint(bt, ts, ht) <= budget_bytes
                        and bt * ts * ht * x_itemsize <= x_block_cap_bytes):
                    return bt, ts, ht, footprint(bt, ts, ht)

    # Nothing fits the soft budget even at the smallest legal tiles (e.g. H has
    # no 128-multiple divisor): take the smallest block; caller raises the vmem
    # limit as far as the chip physically allows.
    bt, ts, ht = min(bt_opts), min(ts_opts), min(ht_opts)
    return bt, ts, ht, footprint(bt, ts, ht)


def _vmem_capacity_bytes(default=64 * 1024 * 1024):
    try:
        return int(pltpu.get_tpu_info().vmem_capacity_bytes)
    except Exception:
        return default   # conservative default: v7x has 64 MiB per TensorCore


def average_k_from_last(encoded_layers, pad_mask, *, k=2, tol=1e-6,
                        block_budget_bytes=None):
    """JAX/Pallas equivalent of AverageKFromLast.forward.

    encoded_layers: list of [B, S, H] float arrays (any float dtype)
    pad_mask:       [B, S] (0/1) mask
    returns:        [B, H] pooled output (float32)
    """
    assert k <= len(encoded_layers), "k should be less than the number of encoder layers"
    x = encoded_layers[-k]                              # (B, S, H), native dtype
    B, S, H = x.shape

    # 0/1 pad mask, lane-dense in S, cast to x.dtype so the MXU sees matched
    # operands (0/1 are exact in bf16).
    mask = pad_mask.astype(x.dtype).reshape(B, 1, S)
    # Denominator hoisted out of the kernel (trivial XLA over a (B,S) int mask).
    inv_den = (1.0 / (jnp.sum(pad_mask.astype(jnp.float32), axis=-1, keepdims=True)
                      + tol)).astype(jnp.float32)       # (B, 1)

    x_item = jnp.dtype(x.dtype).itemsize
    vmem_cap = _vmem_capacity_bytes()
    if block_budget_bytes is None:
        # Generation-aware soft budget for the double-buffered working set.
        block_budget_bytes = min(int(vmem_cap * 0.4), 40 * 1024 * 1024)

    bt, ts, ht, fp = _choose_tiles(B, S, H, x_item, x_item, block_budget_bytes)
    grid = (B // bt, H // ht, S // ts)

    # f32 inputs keep HIGHEST so the MXU MAC does not truncate to bf16;
    # narrower inputs use DEFAULT (single MXU pass).
    precision = jax.lax.Precision.HIGHEST if x.dtype == jnp.float32 else None

    # Never ask for more than physical VMEM (v7x: 64 MiB).
    vmem_limit = int(min(max(fp + (2 << 20), 32 * 1024 * 1024), vmem_cap))

    cost = pl.CostEstimate(
        flops=2 * B * S * H,
        transcendentals=0,
        bytes_accessed=B * S * H * x_item + B * S * x_item + B * H * 4 + B * 4,
    )

    out = pl.pallas_call(
        functools.partial(_avg_k_from_last_kernel, precision=precision),
        out_shape=jax.ShapeDtypeStruct((B, H), jnp.float32),
        grid_spec=pltpu.PrefetchScalarGridSpec(
            num_scalar_prefetch=0,
            grid=grid,
            in_specs=[
                pl.BlockSpec((bt, 1, ts), lambda b, h, s: (b, 0, s)),    # mask
                pl.BlockSpec((bt, ts, ht), lambda b, h, s: (b, s, h)),   # x
                pl.BlockSpec((bt, 1), lambda b, h, s: (b, 0)),           # inv_den
            ],
            out_specs=pl.BlockSpec((bt, ht), lambda b, h, s: (b, h)),
        ),
        compiler_params=pltpu.CompilerParams(
            dimension_semantics=("parallel", "parallel", "arbitrary"),
            vmem_limit_bytes=vmem_limit,
        ),
        cost_estimate=cost,
    )(mask, x, inv_den)
    return out


def _reference(encoded_layers, pad_mask, *, k=2, tol=1e-6):
    x = encoded_layers[-k].astype(jnp.float32)
    m = pad_mask.astype(jnp.float32)[..., None]
    num = jnp.sum(x * m, axis=1)
    den = jnp.sum(m, axis=1) + tol
    return num / den


if __name__ == "__main__":
    key = jax.random.PRNGKey(0)
    B, S, H = 2, 8, 32
    num_layers, k = 4, 2

    keys = jax.random.split(key, num_layers + 1)
    # bf16 encoder outputs: exercises the DEFAULT-precision MXU path with f32
    # accumulation (no wrapper-side upcast of the big tensor).
    encoded_bf16 = [
        jax.random.normal(keys[i], (B, S, H), dtype=jnp.float32).astype(jnp.bfloat16)
        for i in range(num_layers)
    ]
    lengths = jnp.array([6, 3], dtype=jnp.int32)
    pad_mask = (jnp.arange(S)[None, :] < lengths[:, None]).astype(jnp.int32)   # (B, S)

    pooled = jax.block_until_ready(average_k_from_last(encoded_bf16, pad_mask, k=k))
    ref = _reference(encoded_bf16, pad_mask, k=k)
    assert pooled.shape == (B, H) and pooled.dtype == jnp.float32
    assert jnp.allclose(pooled, ref, atol=1e-5, rtol=1e-5), "bf16 path mismatch"

    # f32 encoder outputs: exercises the HIGHEST-precision path (exact MAC).
    encoded_f32 = [layer.astype(jnp.float32) for layer in encoded_bf16]
    pooled32 = jax.block_until_ready(average_k_from_last(encoded_f32, pad_mask, k=k))
    ref32 = _reference(encoded_f32, pad_mask, k=k)
    assert jnp.allclose(pooled32, ref32, atol=1e-5, rtol=1e-5), "f32 path mismatch"

    # Larger shape with a tiny block budget to force H- and S-tiling, which
    # exercises the resident accumulator across multiple reduction steps and
    # the pl.when init/finalize phases.
    B2, S2, H2 = 2, 256, 256
    x_big = jax.random.normal(keys[num_layers], (B2, S2, H2),
                              dtype=jnp.float32).astype(jnp.bfloat16)
    layers_big = [x_big, x_big]
    len_big = jnp.array([200, 64], dtype=jnp.int32)
    mask_big = (jnp.arange(S2)[None, :] < len_big[:, None]).astype(jnp.int32)
    pooled_big = jax.block_until_ready(
        average_k_from_last(layers_big, mask_big, k=2,
                            block_budget_bytes=256 * 1024))
    ref_big = _reference(layers_big, mask_big, k=2)
    assert jnp.allclose(pooled_big, ref_big, atol=1e-4, rtol=1e-4), "tiled path mismatch"

    print("KERNEL_OK")
</pallas_src>

<mosaic_0001>
module attributes {stable_mosaic.version = 11 : i64} {
  func.func @_avg_k_from_last_kernel(%arg0: i32, %arg1: i32, %arg2: i32, %arg3: memref<2x1x8xbf16, #tpu.memory_space<vmem>>, %arg4: memref<2x8x32xbf16, #tpu.memory_space<vmem>>, %arg5: memref<2x1xf32, #tpu.memory_space<vmem>>, %arg6: memref<2x32xf32, #tpu.memory_space<vmem>>) attributes {dimension_semantics = [#tpu.dimension_semantics<parallel>, #tpu.dimension_semantics<parallel>, #tpu.dimension_semantics<arbitrary>], iteration_bounds = array<i64: 1, 1, 1>, scalar_prefetch = 0 : i64, scratch_operands = 0 : i64, tpu.core_type = #tpu.core_type<tc>, window_params = [{transform_indices = @transform_0, window_bounds = array<i64: 2, 1, 8>}, {transform_indices = @transform_1, window_bounds = array<i64: 2, 8, 32>}, {transform_indices = @transform_2, window_bounds = array<i64: 2, 1>}, {transform_indices = @transform_3, window_bounds = array<i64: 2, 32>}]} {
    %c0_i32 = arith.constant 0 : i32
    %0 = arith.cmpi eq, %arg2, %c0_i32 : i32
    %1 = arith.extui %0 : i1 to i32
    %c0_i32_0 = arith.constant 0 : i32
    %2 = arith.cmpi ne, %1, %c0_i32_0 : i32
    scf.if %2 {
      %cst_12 = arith.constant 0.000000e+00 : f32
      %13 = vector.broadcast %cst_12 : f32 to vector<2x32xf32>
      %c0_13 = arith.constant 0 : index
      %c0_14 = arith.constant 0 : index
      %14 = vector.load %arg6[%c0_13, %c0_14] : memref<2x32xf32, #tpu.memory_space<vmem>>, vector<2x32xf32>
      tpu.vector_store %arg6[%c0_13, %c0_14], %13 {strides = array<i32>} : memref<2x32xf32, #tpu.memory_space<vmem>>, vector<2x32xf32>,
    } else {
    }
    %c0 = arith.constant 0 : index
    %c0_1 = arith.constant 0 : index
    %c0_2 = arith.constant 0 : index
    %3 = vector.load %arg3[%c0, %c0_1, %c0_2] : memref<2x1x8xbf16, #tpu.memory_space<vmem>>, vector<2x1x8xbf16>
    %c0_3 = arith.constant 0 : index
    %c0_4 = arith.constant 0 : index
    %c0_5 = arith.constant 0 : index
    %4 = vector.load %arg4[%c0_3, %c0_4, %c0_5] : memref<2x8x32xbf16, #tpu.memory_space<vmem>>, vector<2x8x32xbf16>
    %cst = arith.constant dense<0.000000e+00> : vector<2x1x32xf32>
    %5 = tpu.matmul %3, %4, %cst {dimension_numbers = #tpu.dot_dimension_numbers<[2], [1], [1], [2], [0, 0, 0, 1, 1, 2], [0], [0]>} : vector<2x1x8xbf16>, vector<2x8x32xbf16>, vector<2x1x32xf32> -> vector<2x1x32xf32>
    %c0_6 = arith.constant 0 : index
    %c0_7 = arith.constant 0 : index
    %6 = vector.load %arg6[%c0_6, %c0_7] : memref<2x32xf32, #tpu.memory_space<vmem>>, vector<2x32xf32>
    %7 = vector.shape_cast %5 : vector<2x1x32xf32> to vector<2x32xf32>
    %8 = arith.addf %6, %7 : vector<2x32xf32>
    %c0_8 = arith.constant 0 : index
    %c0_9 = arith.constant 0 : index
    %9 = vector.load %arg6[%c0_8, %c0_9] : memref<2x32xf32, #tpu.memory_space<vmem>>, vector<2x32xf32>
    tpu.vector_store %arg6[%c0_8, %c0_9], %8 {strides = array<i32>} : memref<2x32xf32, #tpu.memory_space<vmem>>, vector<2x32xf32>,
    %c0_i32_10 = arith.constant 0 : i32
    %10 = arith.cmpi eq, %arg2, %c0_i32_10 : i32
    %11 = arith.extui %10 : i1 to i32
    %c0_i32_11 = arith.constant 0 : i32
    %12 = arith.cmpi ne, %11, %c0_i32_11 : i32
    scf.if %12 {
      %c0_12 = arith.constant 0 : index
      %c0_13 = arith.constant 0 : index
      %13 = vector.load %arg6[%c0_12, %c0_13] : memref<2x32xf32, #tpu.memory_space<vmem>>, vector<2x32xf32>
      %c0_14 = arith.constant 0 : index
      %c0_15 = arith.constant 0 : index
      %14 = vector.load %arg5[%c0_14, %c0_15] : memref<2x1xf32, #tpu.memory_space<vmem>>, vector<2x1xf32>
      %15 = vector.broadcast %14 : vector<2x1xf32> to vector<2x32xf32>
      %16 = arith.mulf %13, %15 : vector<2x32xf32>
      %c0_16 = arith.constant 0 : index
      %c0_17 = arith.constant 0 : index
      %17 = vector.load %arg6[%c0_16, %c0_17] : memref<2x32xf32, #tpu.memory_space<vmem>>, vector<2x32xf32>
      tpu.vector_store %arg6[%c0_16, %c0_17], %16 {strides = array<i32>} : memref<2x32xf32, #tpu.memory_space<vmem>>, vector<2x32xf32>,
    } else {
    }
    return
  }
  func.func @transform_0(%arg0: i32, %arg1: i32, %arg2: i32) -> (i32, i32, i32) {
    %c0_i32 = arith.constant 0 : i32
    %c0_i32_0 = arith.constant 0 : i32
    return %arg0, %c0_i32, %arg2 : i32, i32, i32
  }
  func.func @transform_1(%arg0: i32, %arg1: i32, %arg2: i32) -> (i32, i32, i32) {
    %c0_i32 = arith.constant 0 : i32
    return %arg0, %arg2, %arg1 : i32, i32, i32
  }
  func.func @transform_2(%arg0: i32, %arg1: i32, %arg2: i32) -> (i32, i32) {
    %c0_i32 = arith.constant 0 : i32
    %c0_i32_0 = arith.constant 0 : i32
    return %arg0, %c0_i32 : i32, i32
  }
  func.func @transform_3(%arg0: i32, %arg1: i32, %arg2: i32) -> (i32, i32) {
    %c0_i32 = arith.constant 0 : i32
    return %arg0, %arg1 : i32, i32
  }
}

</mosaic_0001>

<bundles_post_ra>
// kernel: tpu_custom_call.1
= control target key start
LH: loop header
LB: loop body
LE: loop exit
PB: predicated region body
PF: predicated region fallthrough
CT: control target
= control target key end

     0   :  { %8 = vsyncpa [#allocation3], 0  ;;  %s226_s0 = inlined_call_operand.vmem [shape: bf16[2,1,8], index: 0, kind: input, shape index: {}]   ;;  %s227_s1 = inlined_call_operand.hbm [shape: bf16[2,8,32], index: 1, kind: input, shape index: {}]   ;;  %s228_s2 = inlined_call_operand.vmem [shape: f32[2,1], index: 2, kind: input, shape index: {}]   ;;  %s229_s3 = inlined_call_operand.hbm [shape: f32[2,32], index: 3, kind: output, shape index: {}]  }
   0x1   :  { %9 = vsyncpa [#allocation4], 0  ;;  %s16_s14 = sshll.u32 %s227_s1, 4  ;;  %s182_s15 = smov [#allocation2]   ;;  %s17_s14 = int_to_ptr.hbm [resolvable:$true] %s16_s14 }
   0x2   :  { %s18_s16 = sshll.u32 %s182_s15, 4  ;;  %s183_s17 = smov 64   ;;  %s19_s16 = int_to_ptr.vmem [resolvable:$true] %s18_s16 }
   0x3   :  { %s184_s18 = smov 4  }
   0x4   :  { %24 = dma.hbm_to_vmem [thread:$0]  %s17_s14, 128, %s19_s16, [#allocation3], %s183_s17, %s183_s17, %s184_s18  }
   0x5   :  { %178 = dma.done.wait [#allocation3], 128  }
   0x6   :  { %179 = vsyncadd [#allocation3], 4294967168  ;;  %v185_v0 = vmov 0   ;;  %vm46_vm0 = vcmask 1043456   ;;  %v40_v1 = vld [vmem:[#allocation2] sm:$0xf] }
   0x7   :  { %129 = vset.pattern.permute.xlu0 %v185_v0  ;;  %v41_v2 = vld [vmem:[#allocation2 + $0x4] sm:$0xf]  ;;  %v48_v3 = vsel %vm46_vm0, %v40_v1, 0  ;;  %v96_v5 = vld [vmem:[%s228_s2] sm:$0x3]  ;;  %vm42_vm1 = vcmask 64512  }
   0x8   :  { %v67_v4 = vsel %vm46_vm0, %v41_v2, 0  ;;  %57 = vmatpush.bf16.msra.mxu0 %v48_v3  ;;  %v38_v6 = vld [vmem:[%s226_s0] sm:$0x1]  ;;  %v39_v7 = vld [vmem:[%s226_s0 + $0x1] sm:$0x1]  ;;  %99 = vperm.xlu0 %129, %v96_v5   ;;  %vm36_vm2 = vcmask 254976  }
   0x9   :  { %76 = vmatpush.bf16.msra.mxu1 %v67_v4  ;;  %v186_v8 = vmov 0.0   ;;  %vm86_vm3 = vcmask 1041409   ;;  %s187_s0 = smov [#allocation5]   ;;  %s111_s26 = sshll.u32 %s229_s3, 4  ;;  %s112_s26 = int_to_ptr.hbm [resolvable:$true] %s111_s26 }
   0xa   :  { %37 = vst.msk [vmem:[#allocation5] sm:$0x3] %vm36_vm2, %v186_v8  ;;  %s109_s2 = sshll.u32 %s187_s0, 4  ;;  %s110_s2 = int_to_ptr.vmem [resolvable:$true] %s109_s2 }
   0xb   :  { %121 = vmatmul.msk.bf16.vlgmr.msra.gmra.mxu0 %vm42_vm1, %v38_v6 }
   0xc   :  { %122 = vmatmul.msk.bf16.vlgmr.msra.gmra.mxu1 %vm42_vm1, %v39_v7 }
  0x11   :  { %v82_v11 = vld [vmem:[#allocation5] sm:$0x3] }
  0x7a   :  { %v100_v17 = vpop.permute.xlu0 %99 }
  0x88   :  { %v59_v9 = vpop.f32.mrf.mxu0 }
  0x89   :  { %v78_v10 = vpop.f32.mrf.mxu1 }
  0x8a   :  { %v85_v12 = vrot.slane %v78_v10, 7 }
  0x8c   :  { %v87_v13 = vsel %vm86_vm3, %v85_v12, %v59_v9 }
  0x8d   :  { %v89_v14 = vadd.f32 %v87_v13, %v82_v11 }
  0x8f   :  { %91 = vst.msk [vmem:[#allocation5] sm:$0x3] %vm36_vm2, %v89_v14 }
  0x90   :  { %v61_v15 = vpop.f32.mrf.mxu0 }
  0x91   :  { %v80_v16 = vpop.f32.mrf.mxu1 }
  0x96   :  { %v95_v18 = vld [vmem:[#allocation5] sm:$0x3] }
  0x97   :  { %v102_v19 = vmul.f32 %v100_v17, %v95_v18 }
  0x99   :  { %103 = vst.msk [vmem:[#allocation5] sm:$0x3] %vm36_vm2, %v102_v19 }
  0x9a   :  { %114 = dma.vmem_to_hbm [thread:$0]  %s110_s2, 32, %s112_s26, [#allocation4]  }
  0x9b   :  { %180 = dma.done.wait [#allocation4], 32  }
  0x9c   :  { %181 = vsyncadd [#allocation4], 4294967264 }
  0x9d   :  { %119 = vsyncpa [#allocation3], 1 }
  0x9e   :  { %120 = vsyncpa [#allocation4], 1 }

</bundles_post_ra>
